<compile_context>
chip_gen: v7x
topology: tpu7x:2x2x1
jax: 0.10.0
libtpu: 0.0.40
codegen_flags: <defaults>
</compile_context>

<pallas_src>
import functools

import jax
import jax.numpy as jnp
from jax.experimental import pallas as pl
from jax.experimental.pallas import tpu as pltpu


# ----------------------------------------------------------------------------
# Pallas kernel: fused 3-layer MLP forward for one batch tile (batch on lanes).
# ----------------------------------------------------------------------------
def _mlp_kernel(scal_ref, x_ref, w1_ref, b1_ref, w2_ref, b2_ref, w3_ref, b3_ref,
                o_ref, *, use_sigmoid: bool, d_out: int,
                negative_slope: float = 0.01):
    inv_s1 = scal_ref[0]
    inv_s2 = scal_ref[1]
    inv_s3 = scal_ref[2]

    x = x_ref[...]                                        # (tb, d_in)

    # Layer 1: SNLinear(D_in -> 32) + LeakyReLU.
    # dot_general "W1 @ x^T": (32, d_in) x (tb, d_in) -> (32, tb).  Batch is on
    # lanes from here on -> all VPU/EUP work and the final store are lane-dense.
    h1 = jax.lax.dot_general(w1_ref[...], x, (((1,), (1,)), ((), ())),
                             preferred_element_type=jnp.float32)
    h1 = h1 * inv_s1 + b1_ref[...]                        # spectral scale folded
    h1 = jnp.where(h1 > 0, h1, negative_slope * h1)

    # Layer 2: SNLinear(32 -> 64) + LeakyReLU: (64, 32) @ (32, tb) -> (64, tb).
    h2 = jnp.dot(w2_ref[...], h1, preferred_element_type=jnp.float32)
    h2 = h2 * inv_s2 + b2_ref[...]
    h2 = jnp.where(h2 > 0, h2, negative_slope * h2)

    # Layer 3: SNLinear(64 -> D_out).
    if d_out == 1:
        # Weight is a (64, 1) column: VPU multiply + sublane (XLU) reduction.
        # Avoids an M=1 MXU pass; result is already a lane-dense (1, tb) row.
        out = jnp.sum(h2 * w3_ref[...], axis=0, keepdims=True)
        out = out * inv_s3 + b3_ref[...]
    else:
        out = jnp.dot(w3_ref[...], h2, preferred_element_type=jnp.float32)
        out = out * inv_s3 + b3_ref[...]

    if use_sigmoid:
        # sigmoid(x) = 1 / (1 + exp(-x)); exp on EUP, divide -> EUP approx recip.
        out = pl.reciprocal(1.0 + jnp.exp(-out), approx=True)

    o_ref[...] = out.astype(o_ref.dtype)                  # lane-dense (d_out, tb)


# ----------------------------------------------------------------------------
# Spectral normalization glue (plain JAX): one power iteration, matching
# torch.nn.utils.spectral_norm's forward math.  Only sigma is needed; the
# kernel consumes raw weights + 1/sigma.
# TODO(synk): torch persists the updated `u` buffer in-place (and runs zero
# iterations in eval mode); here u is read-only, so sigma can drift from the
# PyTorch module over repeated training-mode calls.
# ----------------------------------------------------------------------------
def _spectral_sigma(w, u, eps=1e-12):
    # w: (out, in), u: (out,)
    v = w.T @ u
    v = v / (jnp.linalg.norm(v) + eps)
    u_new = w @ v
    u_new = u_new / (jnp.linalg.norm(u_new) + eps)
    return u_new @ (w @ v)


def _round_up(n, m):
    return -(-n // m) * m


# ----------------------------------------------------------------------------
# Wrapper: tiling decisions + pallas_call.
# ----------------------------------------------------------------------------
def discriminator_forward(x, params, *, use_sigmoid: bool, batch_tile: int = 2048):
    (w1, b1, u1), (w2, b2, u2), (w3, b3, u3) = params

    B, d_in = x.shape
    d_h1 = w1.shape[0]
    d_h2 = w2.shape[0]
    d_out = w3.shape[0]

    # Raw weights stay in HBM unmodified; 1/sigma scalars go to SMEM.
    inv_sigmas = jnp.stack([
        1.0 / _spectral_sigma(w1, u1),
        1.0 / _spectral_sigma(w2, u2),
        1.0 / _spectral_sigma(w3, u3),
    ]).astype(jnp.float32)

    # Biases as columns (broadcast across the lane/batch axis in the kernel).
    b1c = b1.reshape(d_h1, 1)
    b2c = b2.reshape(d_h2, 1)
    b3c = b3.reshape(d_out, 1)
    # D_out == 1: pass the last weight as a (64, 1) column for the VPU+reduce path.
    w3k = w3.T if d_out == 1 else w3

    # Batch tiling (no padding of x: ragged last block is masked by Pallas).
    if B <= 256:
        tb = B                                   # single full block, any alignment
    else:
        tb = min(batch_tile, _round_up(B, 128))
        tb = _round_up(tb, 128)                  # lane-dense output blocks
        if pl.cdiv(B, tb) == 1:
            # Ensure >= 2 grid steps so the "parallel" axis can shard across
            # v7x's 2 TensorCores.
            tb = _round_up(pl.cdiv(B, 2), 128)
    grid = (pl.cdiv(B, tb),)

    vmem = pltpu.MemorySpace.VMEM
    smem = pltpu.MemorySpace.SMEM

    def resident(a):  # full block, constant index_map -> stays resident in VMEM
        return pl.BlockSpec(a.shape, lambda i: (0,) * a.ndim, memory_space=vmem)

    kernel = functools.partial(_mlp_kernel, use_sigmoid=use_sigmoid, d_out=d_out)

    flops = 2 * B * (d_in * d_h1 + d_h1 * d_h2 + d_h2 * d_out)
    transcendentals = (2 * B * d_out) if use_sigmoid else 0
    bytes_accessed = 4 * (B * d_in + B * d_out
                          + d_in * d_h1 + d_h1 * d_h2 + d_h2 * d_out
                          + d_h1 + d_h2 + d_out + 3)

    out = pl.pallas_call(
        kernel,
        out_shape=jax.ShapeDtypeStruct((d_out, B), x.dtype),
        grid=grid,
        in_specs=[
            pl.BlockSpec(memory_space=smem),                                # 1/sigma
            pl.BlockSpec((tb, d_in), lambda i: (i, 0), memory_space=vmem),  # x tile
            resident(w1), resident(b1c),
            resident(w2), resident(b2c),
            resident(w3k), resident(b3c),
        ],
        out_specs=pl.BlockSpec((d_out, tb), lambda i: (0, i), memory_space=vmem),
        compiler_params=pltpu.CompilerParams(
            dimension_semantics=("parallel",)),
        cost_estimate=pl.CostEstimate(
            flops=flops, transcendentals=transcendentals,
            bytes_accessed=bytes_accessed),
    )(inv_sigmas, x, w1, b1c, w2, b2c, w3k, b3c)

    if d_out == 1:
        return out.reshape(B, 1)          # contiguous reshape, no data movement
    return out.T                          # small d_out -> cheap final transpose


# ----------------------------------------------------------------------------
# Deterministic parameter construction (shapes from the module's __init__).
# ----------------------------------------------------------------------------
def init_params(key, d_in, d_hidden1, d_hidden2, d_out):
    ks = jax.random.split(key, 9)

    def linear(kw, kb, ku, fan_in, fan_out):
        bound = 1.0 / jnp.sqrt(fan_in)
        w = jax.random.uniform(kw, (fan_out, fan_in), jnp.float32, -bound, bound)
        b = jax.random.uniform(kb, (fan_out,), jnp.float32, -bound, bound)
        u = jax.random.normal(ku, (fan_out,), jnp.float32)
        u = u / (jnp.linalg.norm(u) + 1e-12)
        return (w, b, u)

    return [
        linear(ks[0], ks[1], ks[2], d_in, d_hidden1),
        linear(ks[3], ks[4], ks[5], d_hidden1, d_hidden2),
        linear(ks[6], ks[7], ks[8], d_hidden2, d_out),
    ]


def _reference_forward(x, params, *, use_sigmoid):
    def sn(w, u):
        return w / _spectral_sigma(w, u)

    (w1, b1, u1), (w2, b2, u2), (w3, b3, u3) = params
    h = x @ sn(w1, u1).T + b1
    h = jnp.where(h > 0, h, 0.01 * h)
    h = h @ sn(w2, u2).T + b2
    h = jnp.where(h > 0, h, 0.01 * h)
    out = h @ sn(w3, u3).T + b3
    if use_sigmoid:
        out = jax.nn.sigmoid(out)
    return out


if __name__ == "__main__":
    # config: input_shape=16, discriminator_output_size=1, discriminator_sigmoid=True
    D_IN, D_OUT = 16, 1
    USE_SIGMOID = True

    key = jax.random.PRNGKey(0)
    kx, kp, kx2 = jax.random.split(key, 3)
    params = init_params(kp, D_IN, 32, 64, D_OUT)

    # Small batch (single full-block path).
    B = 8
    x = jax.random.normal(kx, (B, D_IN), jnp.float32)
    out = discriminator_forward(x, params, use_sigmoid=USE_SIGMOID)
    jax.block_until_ready(out)
    ref = _reference_forward(x, params, use_sigmoid=USE_SIGMOID)
    assert out.shape == (B, D_OUT)
    assert jnp.allclose(out, ref, atol=2e-3, rtol=2e-3), "mismatch vs JAX ref (B=8)"

    # Larger batch exercising the multi-step grid + ragged (masked) last block.
    B2 = 300
    x2 = jax.random.normal(kx2, (B2, D_IN), jnp.float32)
    out2 = discriminator_forward(x2, params, use_sigmoid=USE_SIGMOID,
                                 batch_tile=128)
    jax.block_until_ready(out2)
    ref2 = _reference_forward(x2, params, use_sigmoid=USE_SIGMOID)
    assert out2.shape == (B2, D_OUT)
    assert jnp.allclose(out2, ref2, atol=2e-3, rtol=2e-3), "mismatch vs JAX ref (B=300)"

    print("KERNEL_OK")
</pallas_src>

<mosaic_0001>
module attributes {stable_mosaic.version = 11 : i64} {
  func.func @_mlp_kernel(%arg0: i32, %arg1: memref<3xf32, #tpu.memory_space<smem>>, %arg2: memref<8x16xf32, #tpu.memory_space<vmem>>, %arg3: memref<32x16xf32, #tpu.memory_space<vmem>>, %arg4: memref<32x1xf32, #tpu.memory_space<vmem>>, %arg5: memref<64x32xf32, #tpu.memory_space<vmem>>, %arg6: memref<64x1xf32, #tpu.memory_space<vmem>>, %arg7: memref<64x1xf32, #tpu.memory_space<vmem>>, %arg8: memref<1x1xf32, #tpu.memory_space<vmem>>, %arg9: memref<1x8xf32, #tpu.memory_space<vmem>>) attributes {dimension_semantics = [#tpu.dimension_semantics<parallel>], iteration_bounds = array<i64: 1>, scalar_prefetch = 0 : i64, scratch_operands = 0 : i64, tpu.core_type = #tpu.core_type<tc>, window_params = [{transform_indices = @transform_0, window_bounds = array<i64: 3>}, {transform_indices = @transform_1, window_bounds = array<i64: 8, 16>}, {pipeline_mode = #tpu.pipeline_mode<synchronous>, transform_indices = @transform_2, window_bounds = array<i64: 32, 16>}, {pipeline_mode = #tpu.pipeline_mode<synchronous>, transform_indices = @transform_3, window_bounds = array<i64: 32, 1>}, {pipeline_mode = #tpu.pipeline_mode<synchronous>, transform_indices = @transform_4, window_bounds = array<i64: 64, 32>}, {pipeline_mode = #tpu.pipeline_mode<synchronous>, transform_indices = @transform_5, window_bounds = array<i64: 64, 1>}, {pipeline_mode = #tpu.pipeline_mode<synchronous>, transform_indices = @transform_6, window_bounds = array<i64: 64, 1>}, {pipeline_mode = #tpu.pipeline_mode<synchronous>, transform_indices = @transform_7, window_bounds = array<i64: 1, 1>}, {transform_indices = @transform_8, window_bounds = array<i64: 1, 8>}]} {
    %c0 = arith.constant 0 : index
    %0 = memref.load %arg1[%c0] : memref<3xf32, #tpu.memory_space<smem>>
    %c1 = arith.constant 1 : index
    %1 = memref.load %arg1[%c1] : memref<3xf32, #tpu.memory_space<smem>>
    %c2 = arith.constant 2 : index
    %2 = memref.load %arg1[%c2] : memref<3xf32, #tpu.memory_space<smem>>
    %c0_0 = arith.constant 0 : index
    %c0_1 = arith.constant 0 : index
    %3 = vector.load %arg2[%c0_0, %c0_1] : memref<8x16xf32, #tpu.memory_space<vmem>>, vector<8x16xf32>
    %c0_2 = arith.constant 0 : index
    %c0_3 = arith.constant 0 : index
    %4 = vector.load %arg3[%c0_2, %c0_3] : memref<32x16xf32, #tpu.memory_space<vmem>>, vector<32x16xf32>
    %cst = arith.constant dense<0.000000e+00> : vector<32x8xf32>
    %5 = tpu.matmul %4, %3, %cst {dimension_numbers = #tpu.dot_dimension_numbers<[1], [1], [0], [0], [0, 0, 1, 0], [], []>} : vector<32x16xf32>, vector<8x16xf32>, vector<32x8xf32> -> vector<32x8xf32>
    %6 = vector.broadcast %0 : f32 to vector<32x8xf32>
    %7 = arith.mulf %5, %6 : vector<32x8xf32>
    %c0_4 = arith.constant 0 : index
    %c0_5 = arith.constant 0 : index
    %8 = vector.load %arg4[%c0_4, %c0_5] : memref<32x1xf32, #tpu.memory_space<vmem>>, vector<32x1xf32>
    %9 = vector.broadcast %8 : vector<32x1xf32> to vector<32x8xf32>
    %10 = arith.addf %7, %9 : vector<32x8xf32>
    %cst_6 = arith.constant 0.000000e+00 : f32
    %11 = vector.broadcast %cst_6 : f32 to vector<32x8xf32>
    %12 = arith.cmpf ogt, %10, %11 : vector<32x8xf32>
    %cst_7 = arith.constant 0.00999999977 : f32
    %13 = vector.broadcast %cst_7 : f32 to vector<32x8xf32>
    %14 = arith.mulf %13, %10 : vector<32x8xf32>
    %15 = arith.select %12, %10, %14 : vector<32x8xi1>, vector<32x8xf32>
    %c0_8 = arith.constant 0 : index
    %c0_9 = arith.constant 0 : index
    %16 = vector.load %arg5[%c0_8, %c0_9] : memref<64x32xf32, #tpu.memory_space<vmem>>, vector<64x32xf32>
    %cst_10 = arith.constant dense<0.000000e+00> : vector<64x8xf32>
    %17 = tpu.matmul %16, %15, %cst_10 {dimension_numbers = #tpu.dot_dimension_numbers<[1], [0], [0], [1], [0, 0, 1, 1], [], []>} : vector<64x32xf32>, vector<32x8xf32>, vector<64x8xf32> -> vector<64x8xf32>
    %18 = vector.broadcast %1 : f32 to vector<64x8xf32>
    %19 = arith.mulf %17, %18 : vector<64x8xf32>
    %c0_11 = arith.constant 0 : index
    %c0_12 = arith.constant 0 : index
    %20 = vector.load %arg6[%c0_11, %c0_12] : memref<64x1xf32, #tpu.memory_space<vmem>>, vector<64x1xf32>
    %21 = vector.broadcast %20 : vector<64x1xf32> to vector<64x8xf32>
    %22 = arith.addf %19, %21 : vector<64x8xf32>
    %cst_13 = arith.constant 0.000000e+00 : f32
    %23 = vector.broadcast %cst_13 : f32 to vector<64x8xf32>
    %24 = arith.cmpf ogt, %22, %23 : vector<64x8xf32>
    %cst_14 = arith.constant 0.00999999977 : f32
    %25 = vector.broadcast %cst_14 : f32 to vector<64x8xf32>
    %26 = arith.mulf %25, %22 : vector<64x8xf32>
    %27 = arith.select %24, %22, %26 : vector<64x8xi1>, vector<64x8xf32>
    %c0_15 = arith.constant 0 : index
    %c0_16 = arith.constant 0 : index
    %28 = vector.load %arg7[%c0_15, %c0_16] : memref<64x1xf32, #tpu.memory_space<vmem>>, vector<64x1xf32>
    %29 = vector.broadcast %28 : vector<64x1xf32> to vector<64x8xf32>
    %30 = arith.mulf %27, %29 : vector<64x8xf32>
    %cst_17 = arith.constant dense<0.000000e+00> : vector<8xf32>
    %31 = vector.multi_reduction <add>, %30, %cst_17 [0] : vector<64x8xf32> to vector<8xf32>
    %32 = vector.shape_cast %31 : vector<8xf32> to vector<1x8xf32>
    %33 = vector.broadcast %2 : f32 to vector<1x8xf32>
    %34 = arith.mulf %32, %33 : vector<1x8xf32>
    %c0_18 = arith.constant 0 : index
    %c0_19 = arith.constant 0 : index
    %35 = vector.load %arg8[%c0_18, %c0_19] : memref<1x1xf32, #tpu.memory_space<vmem>>, vector<1x1xf32>
    %36 = vector.broadcast %35 : vector<1x1xf32> to vector<1x8xf32>
    %37 = arith.addf %34, %36 : vector<1x8xf32>
    %cst_20 = arith.constant 0.000000e+00 : f32
    %38 = vector.broadcast %cst_20 : f32 to vector<1x8xf32>
    %39 = arith.subf %38, %37 : vector<1x8xf32>
    %40 = math.exp %39 : vector<1x8xf32>
    %cst_21 = arith.constant 1.000000e+00 : f32
    %41 = vector.broadcast %cst_21 : f32 to vector<1x8xf32>
    %42 = arith.addf %41, %40 : vector<1x8xf32>
    %43 = tpu.reciprocal %42 {approx = true} : vector<1x8xf32> -> vector<1x8xf32>
    %c0_22 = arith.constant 0 : index
    %c0_23 = arith.constant 0 : index
    %44 = vector.load %arg9[%c0_22, %c0_23] : memref<1x8xf32, #tpu.memory_space<vmem>>, vector<1x8xf32>
    tpu.vector_store %arg9[%c0_22, %c0_23], %43 {strides = array<i32>} : memref<1x8xf32, #tpu.memory_space<vmem>>, vector<1x8xf32>,
    return
  }
  func.func @transform_0(%arg0: i32) -> i32 {
    %c0_i32 = arith.constant 0 : i32
    %c0_i32_0 = arith.constant 0 : i32
    return %c0_i32 : i32
  }
  func.func @transform_1(%arg0: i32) -> (i32, i32) {
    %c0_i32 = arith.constant 0 : i32
    %c0_i32_0 = arith.constant 0 : i32
    return %arg0, %c0_i32 : i32, i32
  }
  func.func @transform_2(%arg0: i32) -> (i32, i32) {
    %c0_i32 = arith.constant 0 : i32
    %c0_i32_0 = arith.constant 0 : i32
    %c0_i32_1 = arith.constant 0 : i32
    return %c0_i32, %c0_i32_0 : i32, i32
  }
  func.func @transform_3(%arg0: i32) -> (i32, i32) {
    %c0_i32 = arith.constant 0 : i32
    %c0_i32_0 = arith.constant 0 : i32
    %c0_i32_1 = arith.constant 0 : i32
    return %c0_i32, %c0_i32_0 : i32, i32
  }
  func.func @transform_4(%arg0: i32) -> (i32, i32) {
    %c0_i32 = arith.constant 0 : i32
    %c0_i32_0 = arith.constant 0 : i32
    %c0_i32_1 = arith.constant 0 : i32
    return %c0_i32, %c0_i32_0 : i32, i32
  }
  func.func @transform_5(%arg0: i32) -> (i32, i32) {
    %c0_i32 = arith.constant 0 : i32
    %c0_i32_0 = arith.constant 0 : i32
    %c0_i32_1 = arith.constant 0 : i32
    return %c0_i32, %c0_i32_0 : i32, i32
  }
  func.func @transform_6(%arg0: i32) -> (i32, i32) {
    %c0_i32 = arith.constant 0 : i32
    %c0_i32_0 = arith.constant 0 : i32
    %c0_i32_1 = arith.constant 0 : i32
    return %c0_i32, %c0_i32_0 : i32, i32
  }
  func.func @transform_7(%arg0: i32) -> (i32, i32) {
    %c0_i32 = arith.constant 0 : i32
    %c0_i32_0 = arith.constant 0 : i32
    %c0_i32_1 = arith.constant 0 : i32
    return %c0_i32, %c0_i32_0 : i32, i32
  }
  func.func @transform_8(%arg0: i32) -> (i32, i32) {
    %c0_i32 = arith.constant 0 : i32
    %c0_i32_0 = arith.constant 0 : i32
    return %c0_i32, %arg0 : i32, i32
  }
}

</mosaic_0001>

<bundles_post_ra>
// kernel: tpu_custom_call.1
= control target key start
LH: loop header
LB: loop body
LE: loop exit
PB: predicated region body
PF: predicated region fallthrough
CT: control target
= control target key end

     0   :  { %s845_s0 = inlined_call_operand.vmem [shape: f32[3], index: 0, kind: input, shape index: {}]   ;;  %s846_s1 = inlined_call_operand.vmem [shape: f32[8,16], index: 1, kind: input, shape index: {}]   ;;  %s847_s2 = inlined_call_operand.vmem [shape: f32[32,16], index: 2, kind: input, shape index: {}]   ;;  %s848_s3 = inlined_call_operand.vmem [shape: f32[32,1], index: 3, kind: input, shape index: {}]   ;;  %s849_s4 = inlined_call_operand.vmem [shape: f32[64,32], index: 4, kind: input, shape index: {}]   ;;  %s850_s5 = inlined_call_operand.vmem [shape: f32[64,1], index: 5, kind: input, shape index: {}]   ;;  %s851_s6 = inlined_call_operand.vmem [shape: f32[64,1], index: 6, kind: input, shape index: {}]   ;;  %s852_s7 = inlined_call_operand.<no memory space> [shape: f32[1,1], index: 7, kind: input, shape index: {}]   ;;  %s853_s8 = inlined_call_operand.hbm [shape: f32[1,8], index: 8, kind: output, shape index: {}]  }
   0x1   :  { %v13_v0 = vstv %s852_s7 }
   0x2   :  { %14 = vst [vmem:[#allocation2] sm:$0x1] %v13_v0 }
   0x3   :  { %15 = vsyncpa [#allocation5], 0 }
   0x4   :  { %16 = vsyncpa [#allocation4], 0  ;;  %s23_s9 = sshll.u32 %s845_s0, 4  ;;  %s24_s9 = int_to_ptr.vmem [resolvable:$true] %s23_s9 }
   0x5   :  { %s620_s10 = scalar_lea.vmem %s24_s9, 16  ;;  %p625_p1 = scmp.lt.s32.totalorder %s24_s9, %s24_s9 }
   0x6   :  { %p621_p0 = scmp.ne.s32.totalorder %s24_s9, %s620_s10  ;;  %p626_p2 = scmp.lt.s32.totalorder %s620_s10, %s620_s10 }
   0x8   :  { %p627_p3 = por %p626_p2, %p625_p1 }
   0xa   :  { %p628_p4 = pnand %p627_p3, %p621_p0 }
   0xc   :  { %631 = shalt.err (!%p628_p4)
}
   0xd   :  { %s658_s11 = smov [#allocation3]  }
   0xe   :  { %26 = dma.vmem_to_smem %s24_s9, 16, %s658_s11, [#allocation5]  }
   0xf   :  { %654 = dma.done.wait [#allocation5], 16  }
  0x10   :  { %655 = vsyncadd [#allocation5], 4294967280 }
  0x11   :  { %44 = sfence }
  0x12   :  { %v48_v1 = vld [vmem:[%s846_s1] sm:$0xff]  ;;  %vm53_vm0 = vcmask 130048   ;;  %v50_v4 = vld [vmem:[%s847_s2 + $0x8] sm:$0xff]  ;;  %v659_v5 = vmov 0   ;;  %v161_v6 = vld [vmem:[%s848_s3 + $0x10] sm:$0xff]  ;;  %vm207_vm1 = vcmask 261120  }
  0x13   :  { %v49_v2 = vld [vmem:[%s847_s2] sm:$0xff]  ;;  %571 = vmatprep.subr.msk.mxu0 %vm53_vm0, %v48_v1  ;;  %614 = vset.pattern.permute.xlu0 %v659_v5  ;;  %v51_v7 = vld [vmem:[%s847_s2 + $0x10] sm:$0xff]  ;;  %v160_v8 = vld [vmem:[%s848_s3 + $0x8] sm:$0xff]  ;;  %s45_s11 = sld [smem:[#allocation3]]  ;;  %s539_s20 = sld [smem:[#allocation3 + $0x1]]  ;;  %vm482_vm10 = vcmask 64512  }
  0x14   :  { %573 = vmatprep.mubr.msk.f32.mxu0 %vm53_vm0, %v49_v2  ;;  %v159_v3 = vld [vmem:[%s848_s3] sm:$0xff]  ;;  %572 = vmatpush3.xpose.msk.msra.mxu0 %vm53_vm0, %v48_v1  ;;  %v162_v9 = vld [vmem:[%s848_s3 + $0x18] sm:$0xff]  ;;  %v347_v12 = vld [vmem:[%s850_s5 + $0x8] sm:$0xff]  ;;  %s660_s21 = smov [#allocation6]   ;;  %vm522_vm15 = vcmask 57344  }
  0x15   :  { %165 = vperm.xlu0 %614, %v159_v3   ;;  %615 = vset.pattern.permute.xlu1 %v659_v5  ;;  %v52_v10 = vld [vmem:[%s847_s2 + $0x18] sm:$0xff]  ;;  %v346_v11 = vld [vmem:[%s850_s5] sm:$0xff]  ;;  %v348_v13 = vld [vmem:[%s850_s5 + $0x10] sm:$0xff]  ;;  %s530_s22 = sshll.u32 %s660_s21, 4  ;;  %s531_s22 = int_to_ptr.vmem [resolvable:$true] %s530_s22 }
  0x16   :  { %175 = vperm.xlu1 %615, %v161_v6   ;;  %v349_v14 = vld [vmem:[%s850_s5 + $0x18] sm:$0xff]  ;;  %v426_v15 = vld [vmem:[%s851_s6] sm:$0xff]  ;;  %v427_v16 = vld [vmem:[%s851_s6 + $0x8] sm:$0xff]  ;;  %s632_s23 = scalar_lea.vmem %s531_s22, 16  ;;  %s636_s24 = scalar_lea.vmem %s531_s22, 32 }
  0x17   :  { %574 = vmatmul.mubr.msk.f32.vlgmr.msra.gmra.mrb[0].mxu0 %vm53_vm0, %v50_v4  ;;  %v350_v17 = vld [vmem:[%s850_s5 + $0x20] sm:$0xff]  ;;  %v428_v18 = vld [vmem:[%s851_s6 + $0x10] sm:$0xff]  ;;  %v351_v19 = vld [vmem:[%s850_s5 + $0x28] sm:$0xff]  ;;  %p633_p5 = scmp.ne.s32.totalorder %s531_s22, %s632_s23  ;;  %p637_p6 = scmp.lt.s32.totalorder %s531_s22, %s531_s22 }
  0x18   :  { %576 = vmatprep.mubr.msk.f32.mxu0 %vm53_vm0, %v51_v7  ;;  %v429_v20 = vld [vmem:[%s851_s6 + $0x18] sm:$0xff]  ;;  %v352_v21 = vld [vmem:[%s850_s5 + $0x30] sm:$0xff]  ;;  %v430_v22 = vld [vmem:[%s851_s6 + $0x20] sm:$0xff]  ;;  %p638_p7 = scmp.lt.s32.totalorder %s636_s24, %s632_s23 }
  0x19   :  { %170 = vperm.xlu0 %614, %v160_v8   ;;  %v353_v23 = vld [vmem:[%s850_s5 + $0x38] sm:$0xff]  ;;  %v431_v24 = vld [vmem:[%s851_s6 + $0x28] sm:$0xff]  ;;  %v432_v25 = vld [vmem:[%s851_s6 + $0x30] sm:$0xff]  ;;  %v154_v31 = vstv %s45_s11 }
  0x1a   :  { %180 = vperm.xlu1 %615, %v162_v9   ;;  %v433_v26 = vld [vmem:[%s851_s6 + $0x38] sm:$0xff]  ;;  %v506_v27 = vld [vmem:[#allocation2] sm:$0x1]  ;;  %v201_v29 = vld [vmem:[%s849_s4 + $0x10] sm:$0xff]  ;;  %v337_v7 = vstv %s539_s20  ;;  %p639_p8 = por %p638_p7, %p637_p6 }
  0x1b   :  { %577 = vmatmul.mubr.msk.f32.gmra.mrb[2].mxu0 %vm53_vm0, %v52_v10  ;;  %v199_v28 = vld [vmem:[%s849_s4] sm:$0xff]  ;;  %590 = vmatprep.mubr.msk.f32.mxu1 %vm207_vm1, %v201_v29  ;;  %v200_v57 = vld [vmem:[%s849_s4 + $0x8] sm:$0xff]  ;;  %v202_v58 = vld [vmem:[%s849_s4 + $0x18] sm:$0xff] }
  0x1c   :  { %587 = vmatprep.mubr.msk.f32.mxu0 %vm207_vm1, %v199_v28  ;;  %v203_v59 = vld [vmem:[%s849_s4 + $0x20] sm:$0xff]  ;;  %v204_v60 = vld [vmem:[%s849_s4 + $0x28] sm:$0xff]  ;;  %v205_v61 = vld [vmem:[%s849_s4 + $0x30] sm:$0xff]  ;;  %p640_p9 = pnand %p639_p8, %p633_p5 }
  0x1d   :  { %356 = vperm.xlu0 %614, %v346_v11   ;;  %v206_v62 = vld [vmem:[%s849_s4 + $0x38] sm:$0xff]  ;;  %s540_s4 = sld [smem:[#allocation3 + $0x2]] }
  0x1e   :  { %361 = vperm.xlu1 %615, %v347_v12  }
  0x21   :  { %366 = vperm.xlu0 %614, %v348_v13  }
  0x22   :  { %371 = vperm.xlu1 %615, %v349_v14  }
  0x25   :  { %436 = vperm.xlu0 %614, %v426_v15  }
  0x26   :  { %441 = vperm.xlu1 %615, %v427_v16  }
  0x29   :  { %376 = vperm.xlu0 %614, %v350_v17  }
  0x2a   :  { %446 = vperm.xlu1 %615, %v428_v18  }
  0x2d   :  { %381 = vperm.xlu0 %614, %v351_v19  }
  0x2e   :  { %451 = vperm.xlu1 %615, %v429_v20  }
  0x31   :  { %386 = vperm.xlu0 %614, %v352_v21  }
  0x32   :  { %456 = vperm.xlu1 %615, %v430_v22  }
  0x35   :  { %391 = vperm.xlu0 %614, %v353_v23  }
  0x36   :  { %461 = vperm.xlu1 %615, %v431_v24  }
  0x39   :  { %466 = vperm.xlu0 %614, %v432_v25  }
  0x3a   :  { %471 = vperm.xlu1 %615, %v433_v26  }
  0x3d   :  { %509 = vperm.xlu0 %614, %v506_v27  }
  0x94   :  { %v166_v30 = vpop.permute.xlu0 %165 }
  0x95   :  { %v176_v32 = vpop.permute.xlu1 %175 }
  0x98   :  { %v171_v36 = vpop.permute.xlu0 %170 }
  0x99   :  { %v181_v44 = vpop.permute.xlu1 %180 }
  0x9c   :  { %v357_v63 = vpop.permute.xlu0 %356 }
  0x9d   :  { %v362_v0 = vpop.permute.xlu1 %361 }
  0xa0   :  { %v367_v1 = vpop.permute.xlu0 %366 }
  0xa1   :  { %v372_v2 = vpop.permute.xlu1 %371 }
  0xa4   :  { %v437_v3 = vpop.permute.xlu0 %436 }
  0xa5   :  { %v442_v4 = vpop.permute.xlu1 %441 }
  0xa8   :  { %v377_v5 = vpop.permute.xlu0 %376 }
  0xa9   :  { %v447_v6 = vpop.permute.xlu1 %446 }
  0xac   :  { %v382_v8 = vpop.permute.xlu0 %381 }
  0xad   :  { %v452_v15 = vpop.permute.xlu1 %451 }
  0xb0   :  { %v387_v23 = vpop.permute.xlu0 %386 }
  0xea   :  { %v575_v33 = vpop.f32.mrb[0].mxu0 }
  0xeb   :  { %v156_v34 = vmul.f32 %v575_v33, %v154_v31  ;;  %v135_v35 = vpop.f32.mrb[1].mxu0 }
  0xec   :  { %v155_v37 = vmul.f32 %v154_v31, %v135_v35 }
  0xed   :  { %v184_v38 = vadd.f32 %v171_v36, %v156_v34 }
  0xee   :  { %v183_v39 = vadd.f32 %v166_v30, %v155_v37  ;;  %v578_v40 = vpop.f32.mrb[2].mxu0 }
  0xef   :  { %vm188_vm2 = vcmp.gt.f32.partialorder %v184_v38, 0.0  ;;  %v192_v41 = vmul.f32 0.01, %v184_v38  ;;  %v158_v42 = vmul.f32 %v578_v40, %v154_v31  ;;  %v145_v43 = vpop.f32.mrb[3].mxu0 }
  0xf0   :  { %vm187_vm3 = vcmp.gt.f32.partialorder %v183_v39, 0.0  ;;  %v191_v45 = vmul.f32 0.01, %v183_v39  ;;  %v157_v46 = vmul.f32 %v154_v31, %v145_v43 }
  0xf1   :  { %v196_v47 = vsel %vm188_vm2, %v184_v38, %v192_v41  ;;  %v186_v48 = vadd.f32 %v181_v44, %v158_v42 }
  0xf2   :  { %v195_v49 = vsel %vm187_vm3, %v183_v39, %v191_v45  ;;  %v185_v50 = vadd.f32 %v176_v32, %v157_v46  ;;  %v457_v32 = vpop.permute.xlu1 %456  ;;  %v392_v46 = vpop.permute.xlu0 %391 }
  0xf3   :  { %vm190_vm4 = vcmp.gt.f32.partialorder %v186_v48, 0.0  ;;  %v194_v51 = vmul.f32 0.01, %v186_v48  ;;  %v599_v52 = vpack.c.bf16 %v196_v47, %v195_v49 }
  0xf4   :  { %vm189_vm5 = vcmp.gt.f32.partialorder %v185_v50, 0.0  ;;  %v193_v53 = vmul.f32 0.01, %v185_v50 }
  0xf5   :  { %v198_v54 = vsel %vm190_vm4, %v186_v48, %v194_v51  ;;  %600 = vmatprep.subr.bf16.mxu0 %v599_v52  ;;  %607 = vmatprep.subr.bf16.mxu1 %v599_v52 }
  0xf6   :  { %v197_v55 = vsel %vm189_vm5, %v185_v50, %v193_v53  ;;  %602 = vmatpush3.bf16.msra.mxu0 %v599_v52  ;;  %609 = vmatpush3.bf16.msra.mxu1 %v599_v52 }
  0xf7   :  { %v603_v56 = vpack.c.bf16 %v198_v54, %v197_v55  ;;  %v462_v55 = vpop.permute.xlu1 %461 }
  0xf9   :  { %604 = vmatprep.subr.bf16.mxu0 %v603_v56  ;;  %608 = vmatprep.subr.bf16.mxu1 %v603_v56 }
  0xfa   :  { %606 = vmatpush3.bf16.msra.mxu0 %v603_v56  ;;  %610 = vmatpush3.bf16.msra.mxu1 %v603_v56 }
  0xfd   :  { %588 = vmatmul.mubr.msk.f32.vlgmr.msra.gmra.mrb[4].mxu0 %vm207_vm1, %v200_v57  ;;  %591 = vmatmul.mubr.msk.f32.vlgmr.msra.gmra.mrb[0].mxu1 %vm207_vm1, %v202_v58 }
  0xfe   :  { %593 = vmatprep.mubr.msk.f32.mxu1 %vm207_vm1, %v203_v59 }
 0x101   :  { %594 = vmatmul.mubr.msk.f32.gmra.mrb[2].mxu1 %vm207_vm1, %v204_v60 }
 0x102   :  { %596 = vmatprep.mubr.msk.f32.mxu1 %vm207_vm1, %v205_v61 }
 0x105   :  { %597 = vmatmul.mubr.msk.f32.gmra.mrb[4].mxu1 %vm207_vm1, %v206_v62 }
 0x1d0   :  { %v589_v9 = vpop.f32.mrb[4].mxu0  ;;  %v592_v10 = vpop.f32.mrb[0].mxu1 }
 0x1d1   :  { %v339_v11 = vmul.f32 %v589_v9, %v337_v7  ;;  %v341_v12 = vmul.f32 %v592_v10, %v337_v7  ;;  %v298_v13 = vpop.f32.mrb[5].mxu0  ;;  %v308_v14 = vpop.f32.mrb[1].mxu1 }
 0x1d2   :  { %v338_v16 = vmul.f32 %v337_v7, %v298_v13  ;;  %v340_v17 = vmul.f32 %v337_v7, %v308_v14 }
 0x1d3   :  { %v395_v18 = vadd.f32 %v362_v0, %v339_v11  ;;  %v397_v19 = vadd.f32 %v372_v2, %v341_v12  ;;  %v467_v2 = vpop.permute.xlu0 %466 }
 0x1d4   :  { %v394_v20 = vadd.f32 %v357_v63, %v338_v16  ;;  %v396_v21 = vadd.f32 %v367_v1, %v340_v17  ;;  %v595_v22 = vpop.f32.mrb[2].mxu1 }
 0x1d5   :  { %vm403_vm6 = vcmp.gt.f32.partialorder %v395_v18, 0.0  ;;  %v411_v24 = vmul.f32 0.01, %v395_v18  ;;  %vm405_vm7 = vcmp.gt.f32.partialorder %v397_v19, 0.0  ;;  %v413_v25 = vmul.f32 0.01, %v397_v19 }
 0x1d6   :  { %vm402_vm8 = vcmp.gt.f32.partialorder %v394_v20, 0.0  ;;  %v410_v26 = vmul.f32 0.01, %v394_v20  ;;  %vm404_vm9 = vcmp.gt.f32.partialorder %v396_v21, 0.0  ;;  %v412_v27 = vmul.f32 0.01, %v396_v21 }
 0x1d7   :  { %v419_v28 = vsel %vm403_vm6, %v395_v18, %v411_v24  ;;  %v421_v29 = vsel %vm405_vm7, %v397_v19, %v413_v25  ;;  %v343_v30 = vmul.f32 %v595_v22, %v337_v7  ;;  %v318_v31 = vpop.f32.mrb[3].mxu1  ;;  %v504_v24 = vstv %s540_s4 }
 0x1d8   :  { %v475_v33 = vmul.f32 %v442_v4, %v419_v28  ;;  %v477_v34 = vmul.f32 %v452_v15, %v421_v29  ;;  %v418_v35 = vsel %vm402_vm8, %v394_v20, %v410_v26  ;;  %v420_v36 = vsel %vm404_vm9, %v396_v21, %v412_v27  ;;  %v598_v37 = vpop.f32.mrb[4].mxu1 }
 0x1d9   :  { %v474_v38 = vmul.f32 %v437_v3, %v418_v35  ;;  %v476_v39 = vmul.f32 %v447_v6, %v420_v36  ;;  %v399_v40 = vadd.f32 %v382_v8, %v343_v30  ;;  %v342_v41 = vmul.f32 %v337_v7, %v318_v31  ;;  %v328_v42 = vpop.f32.mrb[5].mxu1  ;;  %v472_v6 = vpop.permute.xlu1 %471 }
 0x1da   :  { %v484_v43 = vsel %vm482_vm10, %v475_v33, 0.0  ;;  %v345_v44 = vmul.f32 %v598_v37, %v337_v7  ;;  %v344_v45 = vmul.f32 %v337_v7, %v328_v42  ;;  %v488_v53 = vsel %vm482_vm10, %v477_v34, 0.0 }
 0x1db   :  { %v483_v47 = vsel %vm482_vm10, %v474_v38, 0.0  ;;  %vm407_vm11 = vcmp.gt.f32.partialorder %v399_v40, 0.0  ;;  %v415_v48 = vmul.f32 0.01, %v399_v40  ;;  %v398_v50 = vadd.f32 %v377_v5, %v342_v41 }
 0x1dc   :  { %v485_v49 = vadd.f32 %v484_v43, %v483_v47  ;;  %v401_v51 = vadd.f32 %v392_v46, %v345_v44  ;;  %v400_v52 = vadd.f32 %v387_v23, %v344_v45  ;;  %v486_v54 = vsel %vm482_vm10, %v476_v39, 0.0  ;;  %v510_v23 = vpop.permute.xlu0 %509 }
 0x1dd   :  { %v423_v57 = vsel %vm407_vm11, %v399_v40, %v415_v48  ;;  %vm406_vm12 = vcmp.gt.f32.partialorder %v398_v50, 0.0  ;;  %v414_v58 = vmul.f32 0.01, %v398_v50  ;;  %v512_v15 = vlaneseq }
 0x1de   :  { %v487_v56 = vadd.f32 %v486_v54, %v485_v49  ;;  %vm409_vm13 = vcmp.gt.f32.partialorder %v401_v51, 0.0  ;;  %v417_v59 = vmul.f32 0.01, %v401_v51  ;;  %vm408_vm14 = vcmp.gt.f32.partialorder %v400_v52, 0.0 }
 0x1df   :  { %v416_v60 = vmul.f32 0.01, %v400_v52  ;;  %v422_v61 = vsel %vm406_vm12, %v398_v50, %v414_v58  ;;  %v479_v63 = vmul.f32 %v462_v55, %v423_v57  ;;  %v513_v18 = vshrl.u32 %v512_v15, 7 }
 0x1e0   :  { %v489_v62 = vadd.f32 %v488_v53, %v487_v56  ;;  %v478_v0 = vmul.f32 %v457_v32, %v422_v61  ;;  %v425_v3 = vsel %vm409_vm13, %v401_v51, %v417_v59 }
 0x1e1   :  { %v424_v1 = vsel %vm408_vm14, %v400_v52, %v416_v60  ;;  %v492_v8 = vsel %vm482_vm10, %v479_v63, 0.0  ;;  %v481_v9 = vmul.f32 %v472_v6, %v425_v3  ;;  %v514_v21 = vsub.s32 0, %v513_v18 }
 0x1e2   :  { %v490_v4 = vsel %vm482_vm10, %v478_v0, 0.0  ;;  %v480_v5 = vmul.f32 %v467_v2, %v424_v1 }
 0x1e3   :  { %v491_v7 = vadd.f32 %v490_v4, %v489_v62  ;;  %v496_v13 = vsel %vm482_vm10, %v481_v9, 0.0  ;;  %v515_v26 = vrot.slane %v510_v23, %v514_v21 }
 0x1e4   :  { %v494_v11 = vsel %vm482_vm10, %v480_v5, 0.0 }
 0x1e5   :  { %v493_v10 = vadd.f32 %v492_v8, %v491_v7 }
 0x1e7   :  { %v495_v12 = vadd.f32 %v494_v11, %v493_v10 }
 0x1e9   :  { %v497_v14 = vadd.f32 %v496_v13, %v495_v12 }
 0x1eb   :  { %v498_v16 = vrot.slane %v497_v14, 4 }
 0x1ed   :  { %v499_v17 = vadd.f32 %v498_v16, %v497_v14 }
 0x1ef   :  { %v500_v19 = vrot.slane %v499_v17, 2 }
 0x1f1   :  { %v501_v20 = vadd.f32 %v500_v19, %v499_v17 }
 0x1f3   :  { %v502_v22 = vrot.slane %v501_v20, 1 }
 0x1f5   :  { %v503_v25 = vadd.f32 %v502_v22, %v501_v20 }
 0x1f7   :  { %v505_v27 = vmul.f32 %v504_v24, %v503_v25 }
 0x1f9   :  { %v516_v28 = vadd.f32 %v515_v26, %v505_v27 }
 0x1fb   :  { %v517_v29 = vsub.f32 0.0, %v516_v28 }
 0x1fd   :  { %v518_v30 = vmul.f32 1.442695, %v517_v29 }
 0x1ff   :  { %616 = vpow2.f32 %v518_v30 }
 0x209   :  { %v617_v31 = vpop.eup %616 }
 0x20a   :  { %v520_v32 = vadd.f32 1.0, %v617_v31 }
 0x20c   :  { %618 = vrcp.f32 %v520_v32 }
 0x216   :  { %v619_v33 = vpop.eup %618 }
 0x217   :  { %523 = vst.msk [vmem:[#allocation6] sm:$0x1] %vm522_vm15, %v619_v33 }
 0x218   :  { %643 = shalt.err (!%p640_p9)
}
 0x219   :  { %s644_s27 = scalar_lea.hbm %s853_s8, 16 }
 0x21a   :  { %p645_p10 = scmp.ne.s32.totalorder %s853_s8, %s644_s27  ;;  %p648_p11 = scmp.lt.u32.totalorder %s644_s27, %s853_s8 }
 0x21c   :  { %p650_p12 = pnand %p648_p11, %p645_p10 }
 0x21e   :  { %653 = shalt.err (!%p650_p12)
}
 0x21f   :  { %533 = dma.vmem_to_hbm [thread:$0]  %s531_s22, 16, %s853_s8, [#allocation4]  }
 0x220   :  { %656 = dma.done.wait [#allocation4], 16  }
 0x221   :  { %657 = vsyncadd [#allocation4], 4294967280 }
 0x222   :  { %537 = vsyncpa [#allocation4], 1 }
 0x223   :  { %538 = vsyncpa [#allocation5], 1 }

</bundles_post_ra>
